<compile_context>
chip_gen: v6e
topology: v6e:2x2x1
jax: 0.10.0
libtpu: 0.0.40
codegen_flags: <defaults>
</compile_context>

<pallas_src>
import functools

import jax
import jax.numpy as jnp
from jax.experimental import pallas as pl
from jax.experimental.pallas import tpu as pltpu


def _round_up(v: int, m: int) -> int:
    return ((v + m - 1) // m) * m


def _ceil_div(a: int, b: int) -> int:
    return -(-a // b)


@functools.lru_cache(maxsize=1)
def _vmem_budget_bytes() -> int:
    """Generation-aware scoped-VMEM budget (v7x: 64 MiB/TC, v5e/v6e: 128 MiB)."""
    cap = 128 * 1024 * 1024
    try:
        info = pltpu.get_tpu_info()
        cap = int(getattr(info, "vmem_capacity_bytes", cap))
    except Exception:
        cap = 64 * 1024 * 1024  # unknown generation: assume the smallest (v7x)
    if cap <= 64 * 1024 * 1024:
        return 48 * 1024 * 1024    # v7x: leave headroom below 64 MiB
    return 100 * 1024 * 1024       # v5e / v6e


def _apply_activation(y, activation):
    if activation is None or activation == "identity":
        return y
    if activation == "relu":
        return jnp.maximum(y, 0.0)
    if activation == "gelu":
        # tanh approximation -> transcendental work lands on the EUP slot.
        return jax.nn.gelu(y, approximate=True)
    if activation == "gelu_exact":
        # erf form (matches PyTorch's default GELU bit-for-bit semantics).
        return jax.nn.gelu(y, approximate=False)
    if activation == "tanh":
        return jnp.tanh(y)
    if activation == "sigmoid":
        return jax.nn.sigmoid(y)
    raise NotImplementedError(f"activation {activation!r} not supported")


def _linear_kernel_single_k(*refs, use_bias: bool, activation):
    # Single K step: dot + bias + activation straight to the output tile.
    if use_bias:
        x_ref, w_ref, b_ref, o_ref = refs
    else:
        x_ref, w_ref, o_ref = refs
        b_ref = None
    x = x_ref[...]
    w = w_ref[...]
    if x.dtype != w.dtype:          # optional bf16 MXU path for f32 containers
        x = x.astype(w.dtype)
    y = jnp.dot(x, w, preferred_element_type=jnp.float32)
    if use_bias:
        y = y + b_ref[...].astype(jnp.float32)   # (1, tn) broadcasts over tm
    y = _apply_activation(y, activation)
    o_ref[...] = y.astype(o_ref.dtype)


def _linear_kernel_multi_k(*refs, use_bias: bool, activation):
    # K-tiled reduction with an f32 VMEM accumulator (P3 pattern).
    if use_bias:
        x_ref, w_ref, b_ref, o_ref, acc_ref = refs
    else:
        x_ref, w_ref, o_ref, acc_ref = refs
        b_ref = None

    k = pl.program_id(2)

    @pl.when(k == 0)
    def _():
        acc_ref[...] = jnp.zeros_like(acc_ref)

    x = x_ref[...]
    w = w_ref[...]
    if x.dtype != w.dtype:
        x = x.astype(w.dtype)
    acc_ref[...] += jnp.dot(x, w, preferred_element_type=jnp.float32)

    @pl.when(k == pl.num_programs(2) - 1)
    def _():
        y = acc_ref[...]
        if use_bias:
            y = y + b_ref[...].astype(jnp.float32)
        y = _apply_activation(y, activation)
        o_ref[...] = y.astype(o_ref.dtype)


class GrowingContainer:
    """JAX/Pallas analogue of gromo's GrowingContainer ('linear' layer_type)."""

    supported_layer_types = ("linear", "convolution")

    def __init__(
        self,
        in_features: int,
        out_features: int,
        use_bias: bool,
        layer_type: str,
        activation: str | None = None,
        seed: int | None = None,
        dtype=jnp.float32,
        compute_dtype=None,   # e.g. jnp.bfloat16 to run f32 params on the bf16 MXU
    ):
        if layer_type not in self.supported_layer_types:
            raise NotImplementedError(
                f"The layer type is not supported. Expected one of "
                f"{list(self.supported_layer_types)}, got {layer_type}"
            )
        if layer_type != "linear":
            # TODO(synk): convolution container forward is not defined by the base class.
            raise NotImplementedError("Only the 'linear' layer_type is realized here.")

        self.in_features = in_features
        self.out_features = out_features
        self.use_bias = use_bias
        self.layer_type = layer_type
        self.activation = activation
        self.dtype = jnp.dtype(dtype)
        self._compute_dtype = (
            jnp.dtype(compute_dtype) if compute_dtype is not None else self.dtype
        )

        # Deterministic parameter init (Kaiming-uniform-like, as nn.Linear would).
        key = jax.random.PRNGKey(0 if seed is None else seed)
        kw, kb = jax.random.split(key)
        bound = 1.0 / (in_features ** 0.5)
        # NOTE: stored pre-transposed relative to PyTorch, i.e. (K, N), so the
        # kernel never transposes a VMEM tile.
        self.weight = jax.random.uniform(
            kw, (in_features, out_features), dtype=self.dtype,
            minval=-bound, maxval=bound,
        )
        if use_bias:
            self.bias = jax.random.uniform(
                kb, (1, out_features), dtype=self.dtype, minval=-bound, maxval=bound
            )
        else:
            self.bias = None

        # ---- default tile plan (batch-independent) + cached padded params ----
        citem = self._compute_dtype.itemsize
        self._tn_default = min(256, _round_up(out_features, 128))
        self._tk_default = min(2048 if citem < 4 else 1024,
                               _round_up(in_features, 128))
        Kp0 = _round_up(in_features, self._tk_default)
        Np0 = _round_up(out_features, self._tn_default)

        w = self.weight.astype(self._compute_dtype)
        if Kp0 != in_features or Np0 != out_features:
            # One-time pad (K padding is zero so the reduction stays exact).
            w = jnp.pad(w, ((0, Kp0 - in_features), (0, Np0 - out_features)))
        self._w_pad = w
        if use_bias:
            b = self.bias
            if Np0 != out_features:
                b = jnp.pad(b, ((0, 0), (0, Np0 - out_features)))
            self._b_pad = b
        else:
            self._b_pad = None

    # ------------------------------------------------------------------ #

    def forward(
        self,
        x: jax.Array,
        *,
        tm: int | None = None,
        tn: int | None = None,
        tk: int | None = None,
        buffer_count: int | None = None,
    ) -> jax.Array:
        assert x.ndim == 2 and x.shape[1] == self.in_features
        B, K = x.shape
        N = self.out_features

        x_item = x.dtype.itemsize
        w_item = self._compute_dtype.itemsize
        out_item = self.dtype.itemsize
        # dtype-aware sublane alignment for the row-tile (8/f32, 16/bf16, 32/int8).
        sub = max(8, 32 // min(x_item, out_item))

        tm_user, tn_user, tk_user = tm, tn, tk
        tn = self._tn_default if tn is None else _round_up(tn, 128)
        tk = self._tk_default if tk is None else _round_up(tk, 128)
        tm = min(512, _round_up(B, sub)) if tm is None else _round_up(tm, sub)

        # Fit the double-buffered footprint under the per-generation VMEM budget.
        budget = _vmem_budget_bytes()

        def _footprint(tm_, tk_):
            f = 2 * (tm_ * tk_ * x_item + tk_ * tn * w_item + tm_ * tn * out_item)
            if self.use_bias:
                f += 2 * tn * w_item
            f += tm_ * tn * 4   # worst-case f32 accumulator scratch
            return f

        while _footprint(tm, tk) > budget and tk > 128:
            tk = max(128, ((tk // 2) // 128) * 128)
        while _footprint(tm, tk) > budget and tm > sub:
            tm = max(sub, ((tm // 2) // sub) * sub)

        grid_m = _ceil_div(B, tm)
        grid_n = _ceil_div(N, tn)
        # Megacore (v7x has 2 TCs): make sure some parallel axis has >=2 blocks.
        if grid_m * grid_n == 1:
            if tn_user is None and N > 128 and tn > 128:
                tn = 128
                grid_n = _ceil_div(N, tn)
            elif tm_user is None and B >= 2 * sub:
                tm = _round_up(_ceil_div(B, 2), sub)
                grid_m = _ceil_div(B, tm)

        Mp = grid_m * tm
        Nr = grid_n * tn
        Kp = _round_up(K, tk)
        grid_k = Kp // tk
        multi_k = grid_k > 1

        # x: pad M (tile alignment) and K (zero padding for the reduction) in
        # one fused pad; output padding is sliced off below.
        xp = x
        if Mp != B or Kp != K:
            xp = jnp.pad(x, ((0, Mp - B), (0, Kp - K)))

        # Weight / bias: use the cached padded copies; only re-pad if the caller
        # requested tiles that outgrow the cached padding.
        w_src = self._w_pad
        b_src = self._b_pad
        if Kp > w_src.shape[0] or Nr > w_src.shape[1]:
            w_src = jnp.pad(self.weight.astype(self._compute_dtype),
                            ((0, Kp - K), (0, Nr - N)))
            if self.use_bias:
                b_src = jnp.pad(self.bias, ((0, 0), (0, Nr - N)))

        def _in_spec(shape, index_map):
            if buffer_count is not None and buffer_count != 2:
                return pl.BlockSpec(shape, index_map,
                                    pipeline_mode=pl.Buffered(buffer_count))
            return pl.BlockSpec(shape, index_map)

        if multi_k:
            grid = (grid_m, grid_n, grid_k)
            in_specs = [
                _in_spec((tm, tk), lambda i, j, k: (i, k)),   # x tile
                _in_spec((tk, tn), lambda i, j, k: (k, j)),   # W tile (pre-transposed)
            ]
            if self.use_bias:
                in_specs.append(pl.BlockSpec((1, tn), lambda i, j, k: (0, j)))
            out_spec = pl.BlockSpec((tm, tn), lambda i, j, k: (i, j))
            scratch = [pltpu.VMEM((tm, tn), jnp.float32)]
            dims = ("parallel", "parallel", "arbitrary")
            kern = _linear_kernel_multi_k
        else:
            grid = (grid_m, grid_n)
            in_specs = [
                _in_spec((tm, tk), lambda i, j: (i, 0)),
                _in_spec((tk, tn), lambda i, j: (0, j)),
            ]
            if self.use_bias:
                in_specs.append(pl.BlockSpec((1, tn), lambda i, j: (0, j)))
            out_spec = pl.BlockSpec((tm, tn), lambda i, j: (i, j))
            scratch = []
            dims = ("parallel", "parallel")
            kern = _linear_kernel_single_k

        operands = [xp, w_src]
        if self.use_bias:
            operands.append(b_src)

        kernel = functools.partial(
            kern, use_bias=self.use_bias, activation=self.activation
        )

        # HBM traffic estimate accounting for reuse: x is streamed once per N
        # block, W once per M block (grid order i, j, k).
        bytes_accessed = (
            grid_n * Mp * Kp * x_item
            + grid_m * Kp * Nr * w_item
            + Mp * Nr * out_item
        )
        if self.use_bias:
            bytes_accessed += grid_m * Nr * out_item
        transcendentals = (
            Mp * Nr if self.activation in ("gelu", "gelu_exact", "tanh", "sigmoid")
            else 0
        )

        out = pl.pallas_call(
            kernel,
            out_shape=jax.ShapeDtypeStruct((Mp, Nr), self.dtype),
            grid_spec=pltpu.PrefetchScalarGridSpec(
                num_scalar_prefetch=0,
                grid=grid,
                in_specs=in_specs,
                out_specs=out_spec,
                scratch_shapes=scratch,
            ),
            compiler_params=pltpu.CompilerParams(
                dimension_semantics=dims,
                vmem_limit_bytes=budget,
            ),
            cost_estimate=pl.CostEstimate(
                flops=2 * Mp * Nr * Kp,
                transcendentals=transcendentals,
                bytes_accessed=bytes_accessed,
            ),
        )(*operands)

        if Mp != B or Nr != N:
            out = out[:B, :N]
        return out

    __call__ = forward

    def extended_forward(self, x: jax.Array) -> jax.Array:
        # TODO(synk): extended_forward is abstract in the PyTorch base class.
        raise NotImplementedError


def _reference_forward(container: GrowingContainer, x: jax.Array) -> jax.Array:
    y = x.astype(jnp.float32) @ container.weight.astype(jnp.float32)
    if container.use_bias:
        y = y + container.bias.astype(jnp.float32)
    return _apply_activation(y, container.activation).astype(container.dtype)


if __name__ == "__main__":
    # Config 1: f32, bias + relu, small shapes; exercises the single-K-step
    # specialized kernel (K=32 padded to one 128-wide tile).
    B, IN, OUT = 8, 32, 128
    c1 = GrowingContainer(IN, OUT, use_bias=True, layer_type="linear",
                          activation="relu", seed=0)
    x1 = jax.random.normal(jax.random.PRNGKey(0), (B, IN), dtype=jnp.float32)
    y1 = jax.block_until_ready(c1(x1))
    y1_ref = _reference_forward(c1, x1)
    assert y1.shape == (B, OUT)
    assert jnp.allclose(y1, y1_ref, atol=1e-4, rtol=1e-4), "mismatch (cfg1)"

    # Config 2: bf16, no bias, gelu; small tiles force the multi-K accumulator
    # path (2 K steps) and a multi-block parallel N axis (3 N tiles).
    B2, IN2, OUT2 = 16, 256, 384
    c2 = GrowingContainer(IN2, OUT2, use_bias=False, layer_type="linear",
                          activation="gelu", seed=1, dtype=jnp.bfloat16)
    x2 = jax.random.normal(jax.random.PRNGKey(1), (B2, IN2), dtype=jnp.bfloat16)
    y2 = jax.block_until_ready(c2.forward(x2, tm=16, tn=128, tk=128))
    y2_ref = _reference_forward(c2, x2)
    assert y2.shape == (B2, OUT2)
    assert jnp.allclose(y2.astype(jnp.float32), y2_ref.astype(jnp.float32),
                        atol=3e-2, rtol=3e-2), "mismatch (cfg2)"

    # Config 3: unaligned shapes (B=12, K=40, N=200) — exercises the fused x
    # pad, the cached N-padded weight, the megacore tn split, and output slicing.
    B3, IN3, OUT3 = 12, 40, 200
    c3 = GrowingContainer(IN3, OUT3, use_bias=True, layer_type="linear",
                          activation="relu", seed=2)
    x3 = jax.random.normal(jax.random.PRNGKey(2), (B3, IN3), dtype=jnp.float32)
    y3 = jax.block_until_ready(c3(x3))
    y3_ref = _reference_forward(c3, x3)
    assert y3.shape == (B3, OUT3)
    assert jnp.allclose(y3, y3_ref, atol=1e-4, rtol=1e-4), "mismatch (cfg3)"

    print("KERNEL_OK")
</pallas_src>

<mosaic_0001>
module attributes {stable_mosaic.version = 11 : i64} {
  func.func @_linear_kernel_single_k(%arg0: i32, %arg1: i32, %arg2: memref<8x128xf32, #tpu.memory_space<vmem>>, %arg3: memref<128x128xf32, #tpu.memory_space<vmem>>, %arg4: memref<1x128xf32, #tpu.memory_space<vmem>>, %arg5: memref<8x128xf32, #tpu.memory_space<vmem>>) attributes {dimension_semantics = [#tpu.dimension_semantics<parallel>, #tpu.dimension_semantics<parallel>], iteration_bounds = array<i64: 1, 1>, scalar_prefetch = 0 : i64, scratch_operands = 0 : i64, tpu.core_type = #tpu.core_type<tc>, window_params = [{transform_indices = @transform_0, window_bounds = array<i64: 8, 128>}, {transform_indices = @transform_1, window_bounds = array<i64: 128, 128>}, {transform_indices = @transform_2, window_bounds = array<i64: 1, 128>}, {transform_indices = @transform_3, window_bounds = array<i64: 8, 128>}]} {
    %c0 = arith.constant 0 : index
    %c0_0 = arith.constant 0 : index
    %0 = vector.load %arg2[%c0, %c0_0] : memref<8x128xf32, #tpu.memory_space<vmem>>, vector<8x128xf32>
    %c0_1 = arith.constant 0 : index
    %c0_2 = arith.constant 0 : index
    %1 = vector.load %arg3[%c0_1, %c0_2] : memref<128x128xf32, #tpu.memory_space<vmem>>, vector<128x128xf32>
    %cst = arith.constant dense<0.000000e+00> : vector<8x128xf32>
    %2 = tpu.matmul %0, %1, %cst {dimension_numbers = #tpu.dot_dimension_numbers<[1], [0], [0], [1], [0, 0, 1, 1], [], []>} : vector<8x128xf32>, vector<128x128xf32>, vector<8x128xf32> -> vector<8x128xf32>
    %c0_3 = arith.constant 0 : index
    %c0_4 = arith.constant 0 : index
    %3 = vector.load %arg4[%c0_3, %c0_4] : memref<1x128xf32, #tpu.memory_space<vmem>>, vector<1x128xf32>
    %4 = vector.broadcast %3 : vector<1x128xf32> to vector<8x128xf32>
    %5 = arith.addf %2, %4 : vector<8x128xf32>
    %cst_5 = arith.constant 0.000000e+00 : f32
    %6 = vector.broadcast %cst_5 : f32 to vector<8x128xf32>
    %7 = arith.maximumf %5, %6 : vector<8x128xf32>
    %c0_6 = arith.constant 0 : index
    %c0_7 = arith.constant 0 : index
    %8 = vector.load %arg5[%c0_6, %c0_7] : memref<8x128xf32, #tpu.memory_space<vmem>>, vector<8x128xf32>
    tpu.vector_store %arg5[%c0_6, %c0_7], %7 {strides = array<i32>} : memref<8x128xf32, #tpu.memory_space<vmem>>, vector<8x128xf32>,
    return
  }
  func.func @transform_0(%arg0: i32, %arg1: i32) -> (i32, i32) {
    %c0_i32 = arith.constant 0 : i32
    %c0_i32_0 = arith.constant 0 : i32
    return %arg0, %c0_i32 : i32, i32
  }
  func.func @transform_1(%arg0: i32, %arg1: i32) -> (i32, i32) {
    %c0_i32 = arith.constant 0 : i32
    %c0_i32_0 = arith.constant 0 : i32
    return %c0_i32, %arg1 : i32, i32
  }
  func.func @transform_2(%arg0: i32, %arg1: i32) -> (i32, i32) {
    %c0_i32 = arith.constant 0 : i32
    %c0_i32_0 = arith.constant 0 : i32
    return %c0_i32, %arg1 : i32, i32
  }
  func.func @transform_3(%arg0: i32, %arg1: i32) -> (i32, i32) {
    %c0_i32 = arith.constant 0 : i32
    return %arg0, %arg1 : i32, i32
  }
}

</mosaic_0001>

<bundles_post_ra>
// kernel: tpu_custom_call.1
= control target key start
LH: loop header
LB: loop body
LE: loop exit
PB: predicated region body
PF: predicated region fallthrough
CT: control target
= control target key end

     0   :  { %8 = vsyncpa [#allocation3], 0  ;;  %s318_s0 = inlined_call_operand.hbm [shape: f32[8,128], index: 0, kind: input, shape index: {}]   ;;  %s319_s1 = inlined_call_operand.hbm [shape: f32[128,128], index: 1, kind: input, shape index: {}]   ;;  %s320_s2 = inlined_call_operand.vmem [shape: f32[1,128], index: 2, kind: input, shape index: {}]   ;;  %s321_s3 = inlined_call_operand.hbm [shape: f32[8,128], index: 3, kind: output, shape index: {}]  }
   0x1   :  { %9 = vsyncpa [#allocation6], 0 }
   0x2   :  { %10 = vsyncpa [#allocation4], 0  ;;  %s279_s12 = smov [#allocation2]   ;;  %s280_s14 = smov [#allocation5]  }
   0x3   :  { %s17_s13 = sshll.u32 %s279_s12, 4  ;;  %s26_s15 = sshll.u32 %s280_s14, 4  ;;  %s18_s13 = int_to_ptr.vmem [resolvable:$true] %s17_s13  ;;  %s27_s15 = int_to_ptr.vmem [resolvable:$true] %s26_s15 }
   0x4   :  { %s221_s16 = scalar_lea.vmem %s18_s13, 128  ;;  %p226_p1 = scmp.lt.s32.totalorder %s18_s13, %s18_s13 }
   0x5   :  { %p222_p0 = scmp.ne.s32.totalorder %s18_s13, %s221_s16  ;;  %p227_p2 = scmp.lt.s32.totalorder %s221_s16, %s221_s16 }
   0x7   :  { %p228_p3 = por %p227_p2, %p226_p1 }
   0x9   :  { %p229_p4 = pnand %p228_p3, %p222_p0 }
   0xb   :  { %232 = shalt.err (!%p229_p4)
}
   0xc   :  { %20 = dma.hbm_to_vmem [thread:$0]  %s318_s0, 128, %s18_s13, [#allocation3]  }
   0xd   :  { %s241_s19 = scalar_lea.vmem %s27_s15, 2048  ;;  %p246_p6 = scmp.lt.s32.totalorder %s27_s15, %s27_s15 }
   0xe   :  { %p242_p5 = scmp.ne.s32.totalorder %s27_s15, %s241_s19  ;;  %p247_p7 = scmp.lt.s32.totalorder %s241_s19, %s241_s19 }
  0x10   :  { %p248_p8 = por %p247_p7, %p246_p6 }
  0x12   :  { %p249_p9 = pnand %p248_p8, %p242_p5 }
  0x14   :  { %252 = shalt.err (!%p249_p9)
}
  0x15   :  { %s281_s20 = smov 128   ;;  %s282_s21 = smov 8  }
  0x16   :  { %32 = dma.hbm_to_vmem [thread:$0]  %s319_s1, 2048, %s27_s15, [#allocation6], %s281_s20, %s281_s20, %s282_s21  }
  0x17   :  { %273 = dma.done.wait [#allocation3], 128  }
  0x18   :  { %274 = vsyncadd [#allocation3], 4294967168 }
  0x19   :  { %275 = dma.done.wait [#allocation6], 2048  }
  0x1a   :  { %276 = vsyncadd [#allocation6], 4294965248  ;;  %v283_v0 = vmov 0.0   ;;  %vm284_vm0 = vmmov 0   ;;  %v57_v1 = vld [vmem:[#allocation5 + $0x78] sm:$0xff]  ;;  %v56_v2 = vld [vmem:[#allocation5 + $0x70] sm:$0xff] }
  0x1b   :  { %171 = vmatprep.subr.mxu0 %v283_v0  ;;  %203 = vmatprep.mubr.msk.f32.mxu0 %vm284_vm0, %v283_v0  ;;  %v55_v3 = vld [vmem:[#allocation5 + $0x68] sm:$0xff]  ;;  %v54_v4 = vld [vmem:[#allocation5 + $0x60] sm:$0xff]  ;;  %v53_v5 = vld [vmem:[#allocation5 + $0x58] sm:$0xff]  ;;  %s285_s24 = smov [#allocation7]  }
  0x1c   :  { %172 = vmatpush3.msra.mxu0 %v57_v1  ;;  %v52_v6 = vld [vmem:[#allocation5 + $0x50] sm:$0xff]  ;;  %v51_v7 = vld [vmem:[#allocation5 + $0x48] sm:$0xff]  ;;  %v50_v8 = vld [vmem:[#allocation5 + $0x40] sm:$0xff]  ;;  %s143_s25 = sshll.u32 %s285_s24, 4  ;;  %s144_s25 = int_to_ptr.vmem [resolvable:$true] %s143_s25 }
  0x1d   :  { %173 = vmatprep.subr.mxu0 %v283_v0  ;;  %v49_v9 = vld [vmem:[#allocation5 + $0x38] sm:$0xff]  ;;  %v48_v10 = vld [vmem:[#allocation5 + $0x30] sm:$0xff]  ;;  %v47_v11 = vld [vmem:[#allocation5 + $0x28] sm:$0xff]  ;;  %s253_s26 = scalar_lea.vmem %s144_s25, 128  ;;  %p258_p11 = scmp.lt.s32.totalorder %s144_s25, %s144_s25 }
  0x1e   :  { %174 = vmatpush3.msra.mxu0 %v56_v2  ;;  %v46_v12 = vld [vmem:[#allocation5 + $0x20] sm:$0xff]  ;;  %v45_v13 = vld [vmem:[#allocation5 + $0x18] sm:$0xff]  ;;  %v44_v14 = vld [vmem:[#allocation5 + $0x10] sm:$0xff]  ;;  %p254_p10 = scmp.ne.s32.totalorder %s144_s25, %s253_s26  ;;  %p259_p12 = scmp.lt.s32.totalorder %s253_s26, %s253_s26 }
  0x1f   :  { %175 = vmatprep.subr.mxu0 %v283_v0  ;;  %v43_v15 = vld [vmem:[#allocation5 + $0x8] sm:$0xff]  ;;  %v42_v16 = vld [vmem:[#allocation5] sm:$0xff]  ;;  %v41_v17 = vld [vmem:[#allocation2] sm:$0xff] }
  0x20   :  { %176 = vmatpush3.msra.mxu0 %v55_v3  ;;  %v153_v18 = vld [vmem:[%s320_s2] ss:$0 sm:$0xff]  ;;  %p260_p13 = por %p259_p12, %p258_p11 }
  0x21   :  { %177 = vmatprep.subr.mxu0 %v283_v0 }
  0x22   :  { %178 = vmatpush3.msra.mxu0 %v54_v4  ;;  %p261_p0 = pnand %p260_p13, %p254_p10 }
  0x23   :  { %179 = vmatprep.subr.mxu0 %v283_v0 }
  0x24   :  { %180 = vmatpush3.msra.mxu0 %v53_v5 }
  0x25   :  { %181 = vmatprep.subr.mxu0 %v283_v0 }
  0x26   :  { %182 = vmatpush3.msra.mxu0 %v52_v6 }
  0x27   :  { %183 = vmatprep.subr.mxu0 %v283_v0 }
  0x28   :  { %184 = vmatpush3.msra.mxu0 %v51_v7 }
  0x29   :  { %185 = vmatprep.subr.mxu0 %v283_v0 }
  0x2a   :  { %186 = vmatpush3.msra.mxu0 %v50_v8 }
  0x2b   :  { %187 = vmatprep.subr.mxu0 %v283_v0 }
  0x2c   :  { %188 = vmatpush3.msra.mxu0 %v49_v9 }
  0x2d   :  { %189 = vmatprep.subr.mxu0 %v283_v0 }
  0x2e   :  { %190 = vmatpush3.msra.mxu0 %v48_v10 }
  0x2f   :  { %191 = vmatprep.subr.mxu0 %v283_v0 }
  0x30   :  { %192 = vmatpush3.msra.mxu0 %v47_v11 }
  0x31   :  { %193 = vmatprep.subr.mxu0 %v283_v0 }
  0x32   :  { %194 = vmatpush3.msra.mxu0 %v46_v12 }
  0x33   :  { %195 = vmatprep.subr.mxu0 %v283_v0 }
  0x34   :  { %196 = vmatpush3.msra.mxu0 %v45_v13 }
  0x35   :  { %197 = vmatprep.subr.mxu0 %v283_v0 }
  0x36   :  { %198 = vmatpush3.msra.mxu0 %v44_v14 }
  0x37   :  { %199 = vmatprep.subr.mxu0 %v283_v0 }
  0x38   :  { %200 = vmatpush3.msra.mxu0 %v43_v15 }
  0x39   :  { %201 = vmatprep.subr.mxu0 %v283_v0 }
  0x3a   :  { %202 = vmatpush3.msra.mxu0 %v42_v16 }
  0x3b   :  { %204 = vmatmul.mubr.f32.vlgmr.msra.gmra.mxu0 %v41_v17 }
  0xfb   :  { %v131_v19 = vpop.f32.mrf.mxu0 }
  0xfc   :  { %v132_v20 = vadd.f32 %v153_v18, %v131_v19 }
  0xfd   :  { %v205_v21 = vpop.f32.mrf.mxu0 }
  0xfe   :  { %v135_v22 = vmax.f32 %v132_v20, 0.0 }
 0x100   :  { %136 = vst [vmem:[#allocation7] sm:$0xff] %v135_v22 }
 0x101   :  { %264 = shalt.err (!%p261_p0)
}
 0x102   :  { %146 = dma.vmem_to_hbm [thread:$0]  %s144_s25, 128, %s321_s3, [#allocation4]  }
 0x103   :  { %277 = dma.done.wait [#allocation4], 128  }
 0x104   :  { %278 = vsyncadd [#allocation4], 4294967168 }
 0x105   :  { %150 = vsyncpa [#allocation3], 1 }
 0x106   :  { %151 = vsyncpa [#allocation6], 1 }
 0x107   :  { %152 = vsyncpa [#allocation4], 1 }

</bundles_post_ra>
